<compile_context>
chip_gen: v6e
topology: v6e:2x2x1
jax: 0.10.0
libtpu: 0.0.40
codegen_flags: <defaults>
</compile_context>

<pallas_src>
import jax
import jax.numpy as jnp
from jax.experimental import pallas as pl
from jax.experimental.pallas import tpu as pltpu


def _fold_to_slab(x):
    """Reduce a (TR, L) f32 tile to an (8, 128) partial-sum slab.

    When the tile is a whole number of (8,128) vregs this is a pure-VPU fold
    (the reshape is a free view of the tiled layout, sum(axis=0) is vreg-wise
    adds).  Otherwise fall back to a full reduce and park the scalar at
    slab[0, 0].  The wrapper sums the whole slab either way.
    """
    tr, l = x.shape
    if l % 128 == 0 and (tr * l) % 1024 == 0:
        return jnp.sum(x.reshape(-1, 8, 128), axis=0)
    s = jnp.sum(x)
    r = jax.lax.broadcasted_iota(jnp.int32, (8, 128), 0)
    c = jax.lax.broadcasted_iota(jnp.int32, (8, 128), 1)
    return jnp.where((r == 0) & (c == 0), s, jnp.float32(0.0))


def _make_kernel(C, tile_rows, lane, rows_total, need_mask):
    def kernel(logits_ref, labels_ref, dpred_ref, dgt_ref,
               ce_out_ref, depth_out_ref):
        # logits_ref: (1, C, tile_rows, lane) native dtype
        # labels_ref: (1, tile_rows, lane) integer
        # dpred/dgt:  (1, tile_rows, lane)
        labels = labels_ref[0]                                  # (TR, L)

        if need_mask:
            row0 = pl.program_id(1) * tile_rows
            rows = jax.lax.broadcasted_iota(jnp.int32, (tile_rows, lane), 0)
            valid = (row0 + rows) < rows_total

        # ---- pass 1: running max over class planes + "picked" logit ----
        # Only (TR, L)-sized accumulators live; each class plane is loaded,
        # consumed and dropped (VMEM pressure independent of C).
        m = None
        picked = jnp.zeros((tile_rows, lane), jnp.float32)
        for c in range(C):
            p = logits_ref[0, c].astype(jnp.float32)            # (TR, L)
            m = p if m is None else jnp.maximum(m, p)
            picked = picked + jnp.where(labels == c, p, 0.0)

        # ---- pass 2: sum exp(plane - max); planes re-read from VMEM ----
        s = jnp.zeros((tile_rows, lane), jnp.float32)
        for c in range(C):
            p = logits_ref[0, c].astype(jnp.float32)
            s = s + jnp.exp(p - m)

        ce_elem = (m + jnp.log(s)) - picked                     # (TR, L)

        # ---- inverse-depth L1: |1/pred - 1/gt| == |gt - pred| / (pred*gt) ----
        dp = dpred_ref[0].astype(jnp.float32)
        dg = dgt_ref[0].astype(jnp.float32)
        d_elem = jnp.abs(dg - dp) / (dp * dg)

        if need_mask:
            ce_elem = jnp.where(valid, ce_elem, 0.0)
            d_elem = jnp.where(valid, d_elem, 0.0)

        ce_out_ref[0, 0] = _fold_to_slab(ce_elem)
        depth_out_ref[0, 0] = _fold_to_slab(d_elem)

    return kernel


def _pick_tile_rows(rows, C, lane, seg_itemsize, labels_itemsize,
                    depth_itemsize, budget_bytes=28 << 20):
    """Largest sublane-aligned row-tile that keeps streamed + temporary VMEM
    under the budget (inputs are double-buffered by the BlockSpec pipeline)."""
    stream_per_row = (2 * C * lane * seg_itemsize      # logits, double-buffered
                      + 2 * lane * labels_itemsize     # labels
                      + 4 * lane * depth_itemsize)     # depth pred + gt
    temps_per_row = 10 * lane * 4                      # f32 in-kernel accumulators
    # Sublane alignment: 8 rows for f32, 16 for bf16, 32 for int8 (packing).
    align = 8 * max(1, 4 // max(1, seg_itemsize))
    tr = budget_bytes // max(1, stream_per_row + temps_per_row)
    tr = max(align, (tr // align) * align)
    return min(rows, tr)


def multi_loss_layer(seg_sigma, depth_sigma, seg_out, depth_out, seg_gt, depth_gt):
    """Forward pass of MultiLossLayer. Returns the scalar final loss."""
    N, C, H, W = seg_out.shape
    M = N * H * W

    # Cast labels only if they are not already an integer dtype (avoid an
    # extra full-array HBM pass when they already are).
    if jnp.issubdtype(seg_gt.dtype, jnp.integer):
        labels = seg_gt
    else:
        labels = seg_gt.astype(jnp.int32)

    # Lane-dense folding: flatten spatial dims to (rows, 128) when possible.
    if (H * W) % 128 == 0:
        lane = 128
        rows = (H * W) // 128
    else:
        lane = W
        rows = H

    seg_view = seg_out.reshape(N, C, rows, lane)
    labels_view = labels.reshape(N, rows, lane)
    dpred_view = depth_out.reshape(N, rows, lane)
    dgt_view = depth_gt.reshape(N, rows, lane)

    tile_rows = _pick_tile_rows(rows, C, lane, seg_out.dtype.itemsize,
                                labels_view.dtype.itemsize,
                                depth_out.dtype.itemsize)
    num_t = pl.cdiv(rows, tile_rows)
    need_mask = (num_t * tile_rows != rows)

    bytes_in = (seg_out.size * seg_out.dtype.itemsize
                + labels_view.size * labels_view.dtype.itemsize
                + depth_out.size * depth_out.dtype.itemsize
                + depth_gt.size * depth_gt.dtype.itemsize)
    bytes_out = 2 * N * num_t * 8 * 128 * 4
    cost = pl.CostEstimate(
        flops=int(M * (6 * C + 10)),
        transcendentals=int(M * (C + 2)),
        bytes_accessed=int(bytes_in + bytes_out),
    )

    kernel = _make_kernel(C, tile_rows, lane, rows, need_mask)

    ce_part, depth_part = pl.pallas_call(
        kernel,
        out_shape=(
            jax.ShapeDtypeStruct((N, num_t, 8, 128), jnp.float32),
            jax.ShapeDtypeStruct((N, num_t, 8, 128), jnp.float32),
        ),
        grid=(N, num_t),
        in_specs=[
            # seg logits, native NCHW (folded), classes as planes, lane-dense.
            pl.BlockSpec((1, C, tile_rows, lane), lambda n, t: (n, 0, t, 0)),
            pl.BlockSpec((1, tile_rows, lane), lambda n, t: (n, t, 0)),
            pl.BlockSpec((1, tile_rows, lane), lambda n, t: (n, t, 0)),
            pl.BlockSpec((1, tile_rows, lane), lambda n, t: (n, t, 0)),
        ],
        out_specs=(
            pl.BlockSpec((1, 1, 8, 128), lambda n, t: (n, t, 0, 0)),
            pl.BlockSpec((1, 1, 8, 128), lambda n, t: (n, t, 0, 0)),
        ),
        compiler_params=pltpu.CompilerParams(
            # Both axes parallel so v7x can split tiles across its 2 TCs;
            # measured as a no-op on v5e/v6e.
            dimension_semantics=("parallel", "parallel"),
            vmem_limit_bytes=48 * 1024 * 1024,
        ),
        cost_estimate=cost,
    )(seg_view, labels_view, dpred_view, dgt_view)

    # Tiny final combine + uncertainty weighting in plain JAX.
    ce = jnp.sum(ce_part) / jnp.float32(M)
    depth_cum = jnp.sum(depth_part)

    ss = jnp.reshape(seg_sigma, ()).astype(jnp.float32)
    ds = jnp.reshape(depth_sigma, ()).astype(jnp.float32)
    seg_loss = ce / jnp.exp(ss)
    depth_loss = depth_cum / (2.0 * jnp.exp(ds))
    sigma_reg = ss + ds
    return seg_loss + depth_loss + sigma_reg


def _reference(seg_sigma, depth_sigma, seg_out, depth_out, seg_gt, depth_gt):
    # Pure-JAX reference for a sanity check.
    N, C, H, W = seg_out.shape
    logits = jnp.transpose(seg_out, (0, 2, 3, 1)).reshape(-1, C)
    labels = seg_gt.reshape(-1).astype(jnp.int32)
    logp = jax.nn.log_softmax(logits, axis=-1)
    ce = -jnp.mean(jnp.take_along_axis(logp, labels[:, None], axis=-1))
    dl = jnp.sum(jnp.abs(1.0 / depth_out - 1.0 / depth_gt))
    ss = jnp.reshape(seg_sigma, ())
    ds = jnp.reshape(depth_sigma, ())
    return ce / jnp.exp(ss) + dl / (2.0 * jnp.exp(ds)) + ss + ds


if __name__ == "__main__":
    key = jax.random.PRNGKey(0)
    k_ss, k_ds, k_seg, k_dep, k_gt, k_dgt = jax.random.split(key, 6)

    # Deterministic "torch.rand(1)"-style parameter init (uniform [0, 1)).
    seg_sigma = jax.random.uniform(k_ss, (1,), dtype=jnp.float32)
    depth_sigma = jax.random.uniform(k_ds, (1,), dtype=jnp.float32)

    # Small shapes consistent with the forward: seg_out NCHW, seg_GT NHW,
    # depth_out/depth_GT N1HW (strictly positive to keep 1/x finite).
    N, C, H, W = 2, 4, 16, 16
    seg_out = jax.random.normal(k_seg, (N, C, H, W), dtype=jnp.float32)
    seg_gt = jax.random.randint(k_gt, (N, H, W), 0, C).astype(jnp.int32)
    depth_out = jax.random.uniform(k_dep, (N, 1, H, W), dtype=jnp.float32,
                                   minval=0.5, maxval=2.0)
    depth_gt = jax.random.uniform(k_dgt, (N, 1, H, W), dtype=jnp.float32,
                                  minval=0.5, maxval=2.0)

    final = multi_loss_layer(seg_sigma, depth_sigma, seg_out, depth_out,
                             seg_gt, depth_gt)
    final = jax.block_until_ready(final)

    ref = _reference(seg_sigma, depth_sigma, seg_out, depth_out, seg_gt, depth_gt)
    assert jnp.allclose(final, ref, rtol=1e-4, atol=1e-4), (final, ref)

    print("KERNEL_OK")
</pallas_src>

<mosaic_0001>
module attributes {stable_mosaic.version = 11 : i64} {
  func.func @kernel(%arg0: i32, %arg1: i32, %arg2: memref<1x4x2x128xf32, #tpu.memory_space<vmem>>, %arg3: memref<1x2x128xi32, #tpu.memory_space<vmem>>, %arg4: memref<1x2x128xf32, #tpu.memory_space<vmem>>, %arg5: memref<1x2x128xf32, #tpu.memory_space<vmem>>, %arg6: memref<1x1x8x128xf32, #tpu.memory_space<vmem>>, %arg7: memref<1x1x8x128xf32, #tpu.memory_space<vmem>>) attributes {dimension_semantics = [#tpu.dimension_semantics<parallel>, #tpu.dimension_semantics<parallel>], iteration_bounds = array<i64: 2, 1>, scalar_prefetch = 0 : i64, scratch_operands = 0 : i64, tpu.core_type = #tpu.core_type<tc>, window_params = [{transform_indices = @transform_0, window_bounds = array<i64: 1, 4, 2, 128>}, {transform_indices = @transform_1, window_bounds = array<i64: 1, 2, 128>}, {transform_indices = @transform_2, window_bounds = array<i64: 1, 2, 128>}, {transform_indices = @transform_3, window_bounds = array<i64: 1, 2, 128>}, {transform_indices = @transform_4, window_bounds = array<i64: 1, 1, 8, 128>}, {transform_indices = @transform_5, window_bounds = array<i64: 1, 1, 8, 128>}]} {
    %c0 = arith.constant 0 : index
    %c0_0 = arith.constant 0 : index
    %c0_1 = arith.constant 0 : index
    %0 = vector.load %arg3[%c0, %c0_0, %c0_1] : memref<1x2x128xi32, #tpu.memory_space<vmem>>, vector<1x2x128xi32>
    %1 = vector.shape_cast %0 : vector<1x2x128xi32> to vector<2x128xi32>
    %cst = arith.constant 0.000000e+00 : f32
    %2 = vector.broadcast %cst : f32 to vector<2x128xf32>
    %c0_2 = arith.constant 0 : index
    %c0_3 = arith.constant 0 : index
    %c0_4 = arith.constant 0 : index
    %c0_5 = arith.constant 0 : index
    %3 = vector.load %arg2[%c0_2, %c0_3, %c0_4, %c0_5] : memref<1x4x2x128xf32, #tpu.memory_space<vmem>>, vector<1x1x2x128xf32>
    %4 = vector.shape_cast %3 : vector<1x1x2x128xf32> to vector<2x128xf32>
    %c0_i32 = arith.constant 0 : i32
    %5 = vector.broadcast %c0_i32 : i32 to vector<2x128xi32>
    %6 = arith.cmpi eq, %1, %5 : vector<2x128xi32>
    %cst_6 = arith.constant 0.000000e+00 : f32
    %7 = vector.broadcast %cst_6 : f32 to vector<2x128xf32>
    %8 = arith.select %6, %4, %7 : vector<2x128xi1>, vector<2x128xf32>
    %9 = arith.addf %2, %8 : vector<2x128xf32>
    %c0_7 = arith.constant 0 : index
    %c1 = arith.constant 1 : index
    %c0_8 = arith.constant 0 : index
    %c0_9 = arith.constant 0 : index
    %10 = vector.load %arg2[%c0_7, %c1, %c0_8, %c0_9] : memref<1x4x2x128xf32, #tpu.memory_space<vmem>>, vector<1x1x2x128xf32>
    %11 = vector.shape_cast %10 : vector<1x1x2x128xf32> to vector<2x128xf32>
    %12 = arith.maximumf %4, %11 : vector<2x128xf32>
    %c1_i32 = arith.constant 1 : i32
    %13 = vector.broadcast %c1_i32 : i32 to vector<2x128xi32>
    %14 = arith.cmpi eq, %1, %13 : vector<2x128xi32>
    %cst_10 = arith.constant 0.000000e+00 : f32
    %15 = vector.broadcast %cst_10 : f32 to vector<2x128xf32>
    %16 = arith.select %14, %11, %15 : vector<2x128xi1>, vector<2x128xf32>
    %17 = arith.addf %9, %16 : vector<2x128xf32>
    %c0_11 = arith.constant 0 : index
    %c2 = arith.constant 2 : index
    %c0_12 = arith.constant 0 : index
    %c0_13 = arith.constant 0 : index
    %18 = vector.load %arg2[%c0_11, %c2, %c0_12, %c0_13] : memref<1x4x2x128xf32, #tpu.memory_space<vmem>>, vector<1x1x2x128xf32>
    %19 = vector.shape_cast %18 : vector<1x1x2x128xf32> to vector<2x128xf32>
    %20 = arith.maximumf %12, %19 : vector<2x128xf32>
    %c2_i32 = arith.constant 2 : i32
    %21 = vector.broadcast %c2_i32 : i32 to vector<2x128xi32>
    %22 = arith.cmpi eq, %1, %21 : vector<2x128xi32>
    %cst_14 = arith.constant 0.000000e+00 : f32
    %23 = vector.broadcast %cst_14 : f32 to vector<2x128xf32>
    %24 = arith.select %22, %19, %23 : vector<2x128xi1>, vector<2x128xf32>
    %25 = arith.addf %17, %24 : vector<2x128xf32>
    %c0_15 = arith.constant 0 : index
    %c3 = arith.constant 3 : index
    %c0_16 = arith.constant 0 : index
    %c0_17 = arith.constant 0 : index
    %26 = vector.load %arg2[%c0_15, %c3, %c0_16, %c0_17] : memref<1x4x2x128xf32, #tpu.memory_space<vmem>>, vector<1x1x2x128xf32>
    %27 = vector.shape_cast %26 : vector<1x1x2x128xf32> to vector<2x128xf32>
    %28 = arith.maximumf %20, %27 : vector<2x128xf32>
    %c3_i32 = arith.constant 3 : i32
    %29 = vector.broadcast %c3_i32 : i32 to vector<2x128xi32>
    %30 = arith.cmpi eq, %1, %29 : vector<2x128xi32>
    %cst_18 = arith.constant 0.000000e+00 : f32
    %31 = vector.broadcast %cst_18 : f32 to vector<2x128xf32>
    %32 = arith.select %30, %27, %31 : vector<2x128xi1>, vector<2x128xf32>
    %33 = arith.addf %25, %32 : vector<2x128xf32>
    %cst_19 = arith.constant 0.000000e+00 : f32
    %34 = vector.broadcast %cst_19 : f32 to vector<2x128xf32>
    %c0_20 = arith.constant 0 : index
    %c0_21 = arith.constant 0 : index
    %c0_22 = arith.constant 0 : index
    %c0_23 = arith.constant 0 : index
    %35 = vector.load %arg2[%c0_20, %c0_21, %c0_22, %c0_23] : memref<1x4x2x128xf32, #tpu.memory_space<vmem>>, vector<1x1x2x128xf32>
    %36 = vector.shape_cast %35 : vector<1x1x2x128xf32> to vector<2x128xf32>
    %37 = arith.subf %36, %28 : vector<2x128xf32>
    %38 = math.exp %37 : vector<2x128xf32>
    %39 = arith.addf %34, %38 : vector<2x128xf32>
    %c0_24 = arith.constant 0 : index
    %c1_25 = arith.constant 1 : index
    %c0_26 = arith.constant 0 : index
    %c0_27 = arith.constant 0 : index
    %40 = vector.load %arg2[%c0_24, %c1_25, %c0_26, %c0_27] : memref<1x4x2x128xf32, #tpu.memory_space<vmem>>, vector<1x1x2x128xf32>
    %41 = vector.shape_cast %40 : vector<1x1x2x128xf32> to vector<2x128xf32>
    %42 = arith.subf %41, %28 : vector<2x128xf32>
    %43 = math.exp %42 : vector<2x128xf32>
    %44 = arith.addf %39, %43 : vector<2x128xf32>
    %c0_28 = arith.constant 0 : index
    %c2_29 = arith.constant 2 : index
    %c0_30 = arith.constant 0 : index
    %c0_31 = arith.constant 0 : index
    %45 = vector.load %arg2[%c0_28, %c2_29, %c0_30, %c0_31] : memref<1x4x2x128xf32, #tpu.memory_space<vmem>>, vector<1x1x2x128xf32>
    %46 = vector.shape_cast %45 : vector<1x1x2x128xf32> to vector<2x128xf32>
    %47 = arith.subf %46, %28 : vector<2x128xf32>
    %48 = math.exp %47 : vector<2x128xf32>
    %49 = arith.addf %44, %48 : vector<2x128xf32>
    %c0_32 = arith.constant 0 : index
    %c3_33 = arith.constant 3 : index
    %c0_34 = arith.constant 0 : index
    %c0_35 = arith.constant 0 : index
    %50 = vector.load %arg2[%c0_32, %c3_33, %c0_34, %c0_35] : memref<1x4x2x128xf32, #tpu.memory_space<vmem>>, vector<1x1x2x128xf32>
    %51 = vector.shape_cast %50 : vector<1x1x2x128xf32> to vector<2x128xf32>
    %52 = arith.subf %51, %28 : vector<2x128xf32>
    %53 = math.exp %52 : vector<2x128xf32>
    %54 = arith.addf %49, %53 : vector<2x128xf32>
    %55 = math.log %54 : vector<2x128xf32>
    %56 = arith.addf %28, %55 : vector<2x128xf32>
    %57 = arith.subf %56, %33 : vector<2x128xf32>
    %c0_36 = arith.constant 0 : index
    %c0_37 = arith.constant 0 : index
    %c0_38 = arith.constant 0 : index
    %58 = vector.load %arg4[%c0_36, %c0_37, %c0_38] : memref<1x2x128xf32, #tpu.memory_space<vmem>>, vector<1x2x128xf32>
    %59 = vector.shape_cast %58 : vector<1x2x128xf32> to vector<2x128xf32>
    %c0_39 = arith.constant 0 : index
    %c0_40 = arith.constant 0 : index
    %c0_41 = arith.constant 0 : index
    %60 = vector.load %arg5[%c0_39, %c0_40, %c0_41] : memref<1x2x128xf32, #tpu.memory_space<vmem>>, vector<1x2x128xf32>
    %61 = vector.shape_cast %60 : vector<1x2x128xf32> to vector<2x128xf32>
    %62 = arith.subf %61, %59 : vector<2x128xf32>
    %63 = math.absf %62 : vector<2x128xf32>
    %64 = arith.mulf %59, %61 : vector<2x128xf32>
    %65 = arith.divf %63, %64 : vector<2x128xf32>
    %66 = vector.shape_cast %57 : vector<2x128xf32> to vector<1x2x128xf32>
    %cst_42 = arith.constant dense<0.000000e+00> : vector<1xf32>
    %67 = vector.multi_reduction <add>, %66, %cst_42 [1, 2] : vector<1x2x128xf32> to vector<1xf32>
    %68 = vector.shape_cast %67 : vector<1xf32> to vector<1x1x1xf32>
    %69 = vector.extract %68[0, 0, 0] : f32 from vector<1x1x1xf32>
    %70 = tpu.iota {dimensions = array<i32: 0>} : vector<8x128xi32>
    %71 = tpu.iota {dimensions = array<i32: 1>} : vector<8x128xi32>
    %c0_i32_43 = arith.constant 0 : i32
    %72 = vector.broadcast %c0_i32_43 : i32 to vector<8x128xi32>
    %73 = arith.cmpi eq, %70, %72 : vector<8x128xi32>
    %c0_i32_44 = arith.constant 0 : i32
    %74 = vector.broadcast %c0_i32_44 : i32 to vector<8x128xi32>
    %75 = arith.cmpi eq, %71, %74 : vector<8x128xi32>
    %76 = arith.andi %73, %75 : vector<8x128xi1>
    %cst_45 = arith.constant 0.000000e+00 : f32
    %77 = vector.broadcast %69 : f32 to vector<8x128xf32>
    %78 = vector.broadcast %cst_45 : f32 to vector<8x128xf32>
    %79 = arith.select %76, %77, %78 : vector<8x128xi1>, vector<8x128xf32>
    %c0_46 = arith.constant 0 : index
    %c0_47 = arith.constant 0 : index
    %c0_48 = arith.constant 0 : index
    %c0_49 = arith.constant 0 : index
    %80 = vector.load %arg6[%c0_46, %c0_47, %c0_48, %c0_49] : memref<1x1x8x128xf32, #tpu.memory_space<vmem>>, vector<1x1x8x128xf32>
    %81 = vector.shape_cast %80 : vector<1x1x8x128xf32> to vector<8x128xf32>
    %82 = vector.shape_cast %79 : vector<8x128xf32> to vector<1x1x8x128xf32>
    tpu.vector_store %arg6[%c0_46, %c0_47, %c0_48, %c0_49], %82 {strides = array<i32>} : memref<1x1x8x128xf32, #tpu.memory_space<vmem>>, vector<1x1x8x128xf32>,
    %83 = vector.shape_cast %65 : vector<2x128xf32> to vector<1x2x128xf32>
    %cst_50 = arith.constant dense<0.000000e+00> : vector<1xf32>
    %84 = vector.multi_reduction <add>, %83, %cst_50 [1, 2] : vector<1x2x128xf32> to vector<1xf32>
    %85 = vector.shape_cast %84 : vector<1xf32> to vector<1x1x1xf32>
    %86 = vector.extract %85[0, 0, 0] : f32 from vector<1x1x1xf32>
    %87 = tpu.iota {dimensions = array<i32: 0>} : vector<8x128xi32>
    %88 = tpu.iota {dimensions = array<i32: 1>} : vector<8x128xi32>
    %c0_i32_51 = arith.constant 0 : i32
    %89 = vector.broadcast %c0_i32_51 : i32 to vector<8x128xi32>
    %90 = arith.cmpi eq, %87, %89 : vector<8x128xi32>
    %c0_i32_52 = arith.constant 0 : i32
    %91 = vector.broadcast %c0_i32_52 : i32 to vector<8x128xi32>
    %92 = arith.cmpi eq, %88, %91 : vector<8x128xi32>
    %93 = arith.andi %90, %92 : vector<8x128xi1>
    %cst_53 = arith.constant 0.000000e+00 : f32
    %94 = vector.broadcast %86 : f32 to vector<8x128xf32>
    %95 = vector.broadcast %cst_53 : f32 to vector<8x128xf32>
    %96 = arith.select %93, %94, %95 : vector<8x128xi1>, vector<8x128xf32>
    %c0_54 = arith.constant 0 : index
    %c0_55 = arith.constant 0 : index
    %c0_56 = arith.constant 0 : index
    %c0_57 = arith.constant 0 : index
    %97 = vector.load %arg7[%c0_54, %c0_55, %c0_56, %c0_57] : memref<1x1x8x128xf32, #tpu.memory_space<vmem>>, vector<1x1x8x128xf32>
    %98 = vector.shape_cast %97 : vector<1x1x8x128xf32> to vector<8x128xf32>
    %99 = vector.shape_cast %96 : vector<8x128xf32> to vector<1x1x8x128xf32>
    tpu.vector_store %arg7[%c0_54, %c0_55, %c0_56, %c0_57], %99 {strides = array<i32>} : memref<1x1x8x128xf32, #tpu.memory_space<vmem>>, vector<1x1x8x128xf32>,
    return
  }
  func.func @transform_0(%arg0: i32, %arg1: i32) -> (i32, i32, i32, i32) {
    %c0_i32 = arith.constant 0 : i32
    %c0_i32_0 = arith.constant 0 : i32
    %c0_i32_1 = arith.constant 0 : i32
    return %arg0, %c0_i32, %arg1, %c0_i32_0 : i32, i32, i32, i32
  }
  func.func @transform_1(%arg0: i32, %arg1: i32) -> (i32, i32, i32) {
    %c0_i32 = arith.constant 0 : i32
    %c0_i32_0 = arith.constant 0 : i32
    return %arg0, %arg1, %c0_i32 : i32, i32, i32
  }
  func.func @transform_2(%arg0: i32, %arg1: i32) -> (i32, i32, i32) {
    %c0_i32 = arith.constant 0 : i32
    %c0_i32_0 = arith.constant 0 : i32
    return %arg0, %arg1, %c0_i32 : i32, i32, i32
  }
  func.func @transform_3(%arg0: i32, %arg1: i32) -> (i32, i32, i32) {
    %c0_i32 = arith.constant 0 : i32
    %c0_i32_0 = arith.constant 0 : i32
    return %arg0, %arg1, %c0_i32 : i32, i32, i32
  }
  func.func @transform_4(%arg0: i32, %arg1: i32) -> (i32, i32, i32, i32) {
    %c0_i32 = arith.constant 0 : i32
    %c0_i32_0 = arith.constant 0 : i32
    %c0_i32_1 = arith.constant 0 : i32
    return %arg0, %arg1, %c0_i32, %c0_i32_0 : i32, i32, i32, i32
  }
  func.func @transform_5(%arg0: i32, %arg1: i32) -> (i32, i32, i32, i32) {
    %c0_i32 = arith.constant 0 : i32
    %c0_i32_0 = arith.constant 0 : i32
    %c0_i32_1 = arith.constant 0 : i32
    return %arg0, %arg1, %c0_i32, %c0_i32_0 : i32, i32, i32, i32
  }
}

</mosaic_0001>

<bundles_post_ra>
// kernel: tpu_custom_call.1
= control target key start
LH: loop header
LB: loop body
LE: loop exit
PB: predicated region body
PF: predicated region fallthrough
CT: control target
= control target key end

     0   :  { %s1285_s0 = inlined_call_operand.hbm [shape: f32[2,4,2,128], index: 0, kind: input, shape index: {}]   ;;  %s1286_s1 = inlined_call_operand.hbm [shape: s32[2,2,128], index: 1, kind: input, shape index: {}]   ;;  %s1287_s2 = inlined_call_operand.hbm [shape: f32[2,2,128], index: 2, kind: input, shape index: {}]   ;;  %s1288_s3 = inlined_call_operand.vmem [shape: f32[2,2,128], index: 3, kind: input, shape index: {}]   ;;  %s1289_s4 = inlined_call_operand.hbm [shape: f32[2,1,8,128], index: 4, kind: output, shape index: {0}]   ;;  %s1290_s5 = inlined_call_operand.hbm [shape: f32[2,1,8,128], index: 5, kind: output, shape index: {1}]  }
   0x1   :  { %1293 = sst [smem:[#allocation17_spill]] %s1285_s0 }
   0x2   :  { %1294 = sst [smem:[#allocation18_spill]] %s1286_s1 }
   0x3   :  { %1295 = sst [smem:[#allocation19_spill]] %s1287_s2 }
   0x4   :  { %11 = vsyncpa [#allocation3], 0 }
   0x5   :  { %13 = vsyncpa [#allocation3 + $0x1], 0 }
   0x6   :  { %14 = vsyncpa [#allocation6], 0 }
   0x7   :  { %16 = vsyncpa [#allocation6 + $0x1], 0 }
   0x8   :  { %17 = vsyncpa [#allocation4], 0 }
   0x9   :  { %19 = vsyncpa [#allocation4 + $0x1], 0 }
   0xa   :  { %20 = vsyncpa [#allocation10], 0 }
   0xb   :  { %22 = vsyncpa [#allocation10 + $0x1], 0  ;;  %s1030_s18 = smov 0   ;;  %s1032_s19 = smov 0  }
   0xc   :  { %s1034_s20 = smov 0   ;;  %s1036_s21 = smov 0  }
   0xd   :  { %s1038_s22 = smov 0   ;;  %s1040_s23 = smov 0  }
   0xe LB: > { %s1061_s24 = sadd.s32 4294967295, %s991_s23   ;;  %s671_s25 = sadd.s32 4294967294, %s991_s23   ;;  %s991_s23 = sphi %s1040_s23, %s28_s23   ;;  %s987_s22 = sphi %s1038_s22, %s1317_s22   ;;  %s983_s21 = sphi %s1036_s21, %s1316_s21   ;;  %s979_s20 = sphi %s1034_s20, %s1315_s20   ;;  %s975_s19 = sphi %s1032_s19, %s1314_s19   ;;  %s971_s18 = sphi %s1030_s18, %s1313_s18  }
   0xf   : > { %s40_s26 = sadd.s32 1, %s987_s22  ;;  %s49_s27 = sadd.s32 1, %s979_s20 }
  0x10   : > { %p42_p0 = scmp.ge.s32.totalorder %s40_s26, 2  ;;  %p56_p1 = scmp.ne.s32.totalorder %s979_s20, %s975_s19 }
  0x11   : > { %p57_p2 = scmp.eq.s32.totalorder %s991_s23, 0  ;;  %p62_p3 = scmp.ne.s32.totalorder %s975_s19, %s971_s18 }
  0x12   : > { %s1319_s26 = smov (%p42_p0, %s40_s26), 0  ;;  %p63_p5 = scmp.eq.s32.totalorder %s1061_s24, 0 }
  0x13   : > { %1296 = sst [smem:[#allocation15_spill]] %s1319_s26  ;;  %p1073_p4 = por %p57_p2, %p56_p1 }
  0x14   : > { %s44_s29 = ssub.s32 %s987_s22, %s1319_s26  ;;  %p172_p6 = scmp.eq.s32.totalorder %s1061_s24, 1 }
  0x15   : > { %p47_p7 = scmp.eq.s32.totalorder %s44_s29, 0  ;;  %p1081_p8 = por %p63_p5, %p62_p3 }
  0x16   : > { %p1085_p9 = por %p172_p6, %p56_p1  ;;  %p178_p10 = scmp.eq.s32.totalorder %s671_s25, 1 }
  0x17   : > { %s1090_s7 = scalar_select %p47_p7, %s979_s20, %s49_s27  }
  0x18   : > { %p1092_p11 = por %p178_p10, %p62_p3  ;;  %p729_p13 = scmp.lt.s32.totalorder %s991_s23, 2 }
  0x19   : > { %1300 = sst [smem:[#allocation16_spill]] %s1090_s7  ;;  %s1099_s9 = sand.u32 1, %s979_s20  }
  0x1a   : > { %s248_s10 = sand.u32 1, %s991_s23   ;;  %s1292_s11 = sshll.u32 %s1099_s9, 1 }
  0x1b   : > { %p1105_p0 = pnand %p729_p13, %p1073_p4  ;;  %s678_s13 = sshll.u32 %s987_s22, 5 }
  0x1c   : > { %s1303_s1 = sld [smem:[#allocation18_spill]]  ;;  %s252_s17 = scalar_lea.vmem [#allocation5], %s1292_s11 }
  0x1d   : > { %s260_s25 = sshll.u32 %s252_s17, 4  ;;  %s1304_s2 = sld [smem:[#allocation19_spill]]  ;;  %s261_s25 = int_to_ptr.vmem [resolvable:$true] %s260_s25 }
  0x1e   : > { %s1120_s28 = scalar_lea.sflag [#allocation6], %s248_s10  ;;  %p795_p1 = pneg %p1105_p0 }
  0x1f   : > { %s806_s7 = scalar_lea.vmem %s261_s25, 32  ;;  %s993_s14 = smov [#allocation5]  }
  0x20   : > { %p807_p2 = scmp.ne.s32.totalorder %s261_s25, %s806_s7  ;;  %s811_s15 = sshll.u32 %s993_s14, 4  ;;  %s812_s15 = int_to_ptr.vmem [resolvable:$false] %s811_s15 }
  0x21   : > { %s813_s17 = scalar_lea.vmem %s812_s15, 64  ;;  %p814_p5 = scmp.lt.s32.totalorder %s261_s25, %s812_s15 }
  0x22   : > { %s258_s16 = scalar_lea.hbm %s1303_s1, %s678_s13  ;;  %p809_p3 = pnand %p807_p2, %p795_p1 }
  0x23   : > { %s1118_s26 = scalar_lea.hbm %s1304_s2, %s678_s13  ;;  %p815_p6 = scmp.lt.s32.totalorder %s813_s17, %s806_s7 }
  0x24   : > { %p810_p4 = pneg %p809_p3 }
  0x25   : > { %p816_p7 = por %p815_p6, %p814_p5 }
  0x27   : > { %p817_p10 = pnand %p816_p7, %p810_p4 }
  0x29   : > { %820 = shalt.err (!%p817_p10)
}
  0x2a   : > { %718 = dma.hbm_to_vmem [thread:$0]  (!%p1105_p0), %s258_s16, 32, %s261_s25, %s1120_s28  }
  0x2b   : > { %p681_p13 = scmp.ge.s32.totalorder %s991_s23, 1  ;;  %p294_p2 = scmp.lt.s32.totalorder %s991_s23, 3 }
  0x2c   : > { %s674_s7 = sshll.u32 %s1099_s9, 3  ;;  %s697_s13 = sshll.u32 %s987_s22, 7 }
  0x2d   : > { %p1132_p3 = pnand %p681_p13, %p294_p2  ;;  %s1306_s0 = sld [smem:[#allocation17_spill]] }
  0x2e   : > { %s230_s15 = scalar_lea.vmem [#allocation2], %s674_s7  ;;  %s227_s11 = scalar_lea.sflag [#allocation3], %s1099_s9 }
  0x2f   : > { %s238_s17 = sshll.u32 %s230_s15, 4  ;;  %s994_s16 = smov [#allocation2]   ;;  %s239_s17 = int_to_ptr.vmem [resolvable:$true] %s238_s17 }
  0x30   : > { %s834_s1 = scalar_lea.vmem %s239_s17, 128  ;;  %s839_s25 = sshll.u32 %s994_s16, 4  ;;  %s840_s25 = int_to_ptr.vmem [resolvable:$false] %s839_s25 }
  0x31   : > { %p835_p4 = scmp.ne.s32.totalorder %s239_s17, %s834_s1  ;;  %s841_s2 = scalar_lea.vmem %s840_s25, 256 }
  0x32   : > { %p842_p7 = scmp.lt.s32.totalorder %s239_s17, %s840_s25  ;;  %p843_p10 = scmp.lt.s32.totalorder %s841_s2, %s834_s1 }
  0x33   : > { %s237_s14 = scalar_lea.hbm %s1306_s0, %s697_s13  ;;  %p837_p5 = pnand %p835_p4, %p795_p1 }
  0x34   : > { %p844_p13 = por %p843_p10, %p842_p7 }
  0x35   : > { %p838_p6 = pneg %p837_p5 }
  0x37   : > { %p845_p2 = pnand %p844_p13, %p838_p6 }
  0x39   : > { %848 = shalt.err (!%p845_p2)
}
  0x3a   : > { %s995_s13 = smov 32   ;;  %s996_s7 = smov 2  }
  0x3b   : > { %715 = dma.hbm_to_vmem [thread:$0]  (!%p1105_p0), %s237_s14, 128, %s239_s17, %s227_s11, %s995_s13, %s995_s13, %s996_s7  }
  0x3c   : > { %s1307_s27 = sshll.u32 %s1099_s9, 1  ;;  %s997_s1 = smov [#allocation7]  }
  0x3d   : > { %s271_s29 = scalar_lea.vmem [#allocation7], %s1307_s27  ;;  %s867_s2 = sshll.u32 %s997_s1, 4  ;;  %s868_s2 = int_to_ptr.vmem [resolvable:$false] %s867_s2 }
  0x3e   : > { %s279_s15 = sshll.u32 %s271_s29, 4  ;;  %s869_s16 = scalar_lea.vmem %s868_s2, 64  ;;  %s280_s15 = int_to_ptr.vmem [resolvable:$true] %s279_s15 }
  0x3f   : > { %s862_s0 = scalar_lea.vmem %s280_s15, 32  ;;  %p870_p6 = scmp.lt.s32.totalorder %s280_s15, %s868_s2 }
  0x40   : > { %p863_p4 = scmp.ne.s32.totalorder %s280_s15, %s862_s0  ;;  %p871_p7 = scmp.lt.s32.totalorder %s869_s16, %s862_s0 }
  0x42   : > { %p865_p5 = pnand %p863_p4, %p795_p1  ;;  %p872_p10 = por %p871_p7, %p870_p6 }
  0x44   : > { %p866_p12 = pneg %p865_p5 }
  0x46   : > { %p873_p13 = pnand %p872_p10, %p866_p12 }
  0x48   : > { %876 = shalt.err (!%p873_p13)
}
  0x49   : > { %721 = dma.hbm_to_vmem [thread:$0]  (!%p1105_p0), %s1118_s26, 32, %s280_s15, %s1120_s28  }
  0x4a   : > { %298 = sbr.rel (%p1132_p3) target bundleno = 375 (0x177), region = 36  ;;  %s1159_s9 = sand.u32 (!%p1132_p3), 1, %s975_s19  }
  0x4b   : > { %s1162_s11 = sshll.u32 (!%p1132_p3), %s1159_s9, 3  ;;  %s301_s0 = scalar_lea.sflag (!%p1132_p3), [#allocation3], %s1159_s9 }
  0x4c   : > { %s304_s14 = scalar_lea.vmem (!%p1132_p3), [#allocation2], %s1162_s11 }
  0x4f   : > { %954 = dma.done.wait (%p1081_p8), %s301_s0, 128  }
  0x50   : > { %956 = vsyncadd (%p1081_p8), %s301_s0, 4294967168  ;;  %s309_s26 = sand.u32 1, %s1061_s24   ;;  %s683_s12 = sshll.u32 %s1159_s9, 1 }
  0x51   : > { %s310_s28 = scalar_lea.sflag [#allocation6], %s309_s26  ;;  %s1174_s10 = scalar_lea.vmem [#allocation5], %s683_s12 }
  0x52   : > { %958 = dma.done.wait (%p1081_p8), %s310_s28, 64  }
  0x53   : > { %960 = vsyncadd (%p1081_p8), %s310_s28, 4294967232  ;;  %v379_v0 = vld [vmem:[%s304_s14] sm:$0x3]  ;;  %v688_v1 = vld [vmem:[%s304_s14 + $0x2] sm:$0x3]  ;;  %p371_p8 = scmp.lt.s32.totalorder %s983_s21, 1  ;;  %v439_v57 = vlaneseq }
  0x54   : > { %v385_v2 = vmax.f32 %v379_v0, %v688_v1  ;;  %v689_v3 = vld [vmem:[%s304_s14 + $0x4] sm:$0x3]  ;;  %v690_v4 = vld [vmem:[%s304_s14 + $0x6] sm:$0x3]  ;;  %s322_s7 = scalar_lea.vmem [#allocation7], %s683_s12  ;;  %vm428_vm4 = vcmask 1041408  }
  0x55   : > { %s372_s24 = scalar_select %p371_p8, %s983_s21, 1  ;;  %v421_v20 = vld [vmem:[%s322_s7] sm:$0x3]  ;;  %v378_v23 = vld [vmem:[%s1174_s10] sm:$0x3]  ;;  %v440_v58 = vshrl.u32 %v439_v57, 7 }
  0x56   : > { %v391_v5 = vmax.f32 %v385_v2, %v689_v3  ;;  %vm380_vm0 = vcmp.eq.s32.totalorder %v378_v23, 0  ;;  %vm386_vm1 = vcmp.eq.s32.totalorder %v378_v23, 1  ;;  %vm392_vm2 = vcmp.eq.s32.totalorder %v378_v23, 2  ;;  %s693_s27 = sshll.u32 %s983_s21, 7  ;;  %s363_s29 = scalar_lea.vmem [#allocation8], %s1162_s11 }
  0x57   : > { %s687_s30 = sshll.u32 %s372_s24, 1  ;;  %v381_v26 = vsel %vm380_vm0, %v379_v0, 0.0  ;;  %v387_v27 = vsel %vm386_vm1, %v688_v1, 0.0  ;;  %v393_v29 = vsel %vm392_vm2, %v689_v3, 0.0  ;;  %vm398_vm3 = vcmp.eq.s32.totalorder %v378_v23, 3  ;;  %s482_s15 = sshll.u32 %s363_s29, 4  ;;  %s1204_s15 = int_to_ptr.vmem [resolvable:$true] %s482_s15 }
  0x58   : > { %v397_v6 = vmax.f32 %v391_v5, %v690_v4  ;;  %s377_s13 = scalar_lea.vmem %s1288_s3, %s687_s30  ;;  %v388_v28 = vadd.f32 %v387_v27, %v381_v26  ;;  %v399_v32 = vsel %vm398_vm3, %v690_v4, 0.0  ;;  %v442_v59 = vand.u32 127, %v439_v57  ;;  %s370_s2 = scalar_lea.vmem [#allocation9], %s1162_s11 }
  0x59   : > { %v422_v21 = vld [vmem:[%s377_s13] sm:$0x3]  ;;  %vm443_vm5 = vcmp.eq.s32.totalorder %v440_v58, 0  ;;  %s496_s16 = sshll.u32 %s370_s2, 4  ;;  %s1202_s26 = scalar_lea.hbm %s1289_s4, %s693_s27  ;;  %s1213_s16 = int_to_ptr.vmem [resolvable:$true] %s496_s16 }
  0x5a   : > { %v401_v7 = vsub.f32 %v379_v0, %v397_v6  ;;  %v405_v8 = vsub.f32 %v688_v1, %v397_v6  ;;  %v409_v9 = vsub.f32 %v689_v3, %v397_v6  ;;  %v413_v10 = vsub.f32 %v690_v4, %v397_v6  ;;  %s1209_s28 = scalar_lea.hbm %s1290_s5, %s693_s27  ;;  %s463_s24 = scalar_lea.sflag [#allocation4], %s1159_s9 }
  0x5b   : > { %v425_v25 = vmul.f32 %v422_v21, %v421_v20  ;;  %v394_v30 = vadd.f32 %v393_v29, %v388_v28  ;;  %v423_v31 = vsub.f32 %v422_v21, %v421_v20  ;;  %vm444_vm6 = vcmp.eq.s32.totalorder %v442_v59, 0  ;;  %s877_s30 = scalar_lea.vmem %s1204_s15, 128  ;;  %s998_s17 = smov [#allocation8]  }
  0x5c   : > { %v402_v11 = vmul.f32 1.442695, %v401_v7  ;;  %v406_v12 = vmul.f32 1.442695, %v405_v8  ;;  %v410_v13 = vmul.f32 1.442695, %v409_v9  ;;  %vm1188_vm7 = vmand %vm443_vm5, %vm444_vm6  ;;  %p878_p12 = scmp.ne.s32.totalorder %s1204_s15, %s877_s30 }
  0x5d   : > { %v414_v14 = vmul.f32 1.442695, %v413_v10  ;;  %v400_v34 = vadd.f32 %v399_v32, %v394_v30  ;;  %v424_v36 = vand.u32 2147483647, %v423_v31  ;;  %s881_s25 = sshll.u32 %s998_s17, 4  ;;  %s882_s25 = int_to_ptr.vmem [resolvable:$false] %s881_s25 }
  0x5e   : > { %781 = vpow2.f32 %v402_v11  ;;  %p879_p0 = pnand %p878_p12, %p1085_p9  ;;  %s883_s13 = scalar_lea.vmem %s882_s25, 256 }
  0x5f   : > { %783 = vpow2.f32 %v406_v12  ;;  %p884_p3 = scmp.lt.s32.totalorder %s1204_s15, %s882_s25  ;;  %p885_p2 = scmp.lt.s32.totalorder %s883_s13, %s877_s30 }
  0x60   : > { %785 = vpow2.f32 %v410_v13  ;;  %p880_p1 = pneg %p879_p0 }
  0x61   : > { %787 = vpow2.f32 %v414_v14  ;;  %p886_p4 = por %p885_p2, %p884_p3 }
  0x63   : > { %p887_p5 = pnand %p886_p4, %p880_p1 }
  0x6b   : > { %v782_v15 = vpop.eup %781 }
  0x6c   : > { %v784_v16 = vpop.eup %783 }
  0x6d   : > { %v786_v17 = vpop.eup %785  ;;  %v408_v18 = vadd.f32 %v784_v16, %v782_v15 }
  0x6e   : > { %v788_v19 = vpop.eup %787 }
  0x6f   : > { %v412_v22 = vadd.f32 %v786_v17, %v408_v18 }
  0x71   : > { %v416_v24 = vadd.f32 %v788_v19, %v412_v22 }
  0x73   : > { %789 = vlog2.f32 %v416_v24 }
  0x74   : > { %791 = vrcp.f32 %v425_v25 }
  0x80   : > { %v790_v33 = vpop.eup %789 }
  0x81   : > { %v418_v35 = vmul.f32 0.6931472, %v790_v33  ;;  %v792_v37 = vpop.eup %791 }
  0x82   : > { %v427_v40 = vmul.f32 %v792_v37, %v424_v36 }
  0x83   : > { %v419_v38 = vadd.f32 %v418_v35, %v397_v6 }
  0x84   : > { %v449_v42 = vsel %vm428_vm4, %v427_v40, 0.0 }
  0x85   : > { %v420_v39 = vsub.f32 %v419_v38, %v400_v34 }
  0x87   : > { %v429_v41 = vsel %vm428_vm4, %v420_v39, 0.0 }
  0x88   : > { %430 = vadd.xlane.f32.xlu0 %v429_v41 }
  0x8c   : > { %450 = vadd.xlane.f32.xlu0 %v449_v42 }
 0x111   : > { %v431_v43 = vpop.xlane.xlu0 %430 }
 0x112   : > { %v432_v44 = vrot.slane %v431_v43, 4 }
 0x114   : > { %v433_v45 = vadd.f32 %v432_v44, %v431_v43 }
 0x115   : > { %v451_v46 = vpop.xlane.xlu0 %450 }
 0x116   : > { %v434_v47 = vrot.slane %v433_v45, 2  ;;  %v452_v48 = vrot.slane %v451_v46, 4 }
 0x118   : > { %v453_v49 = vadd.f32 %v452_v48, %v451_v46  ;;  %v435_v50 = vadd.f32 %v434_v47, %v433_v45 }
 0x11a   : > { %v454_v51 = vrot.slane %v453_v49, 2  ;;  %v436_v52 = vrot.slane %v435_v50, 1 }
 0x11c   : > { %v455_v53 = vadd.f32 %v454_v51, %v453_v49  ;;  %v437_v54 = vadd.f32 %v436_v52, %v435_v50 }
 0x11e   : > { %698 = vpush %v437_v54  ;;  %v456_v55 = vrot.slane %v455_v53, 1 }
 0x120   : > { %v457_v56 = vadd.f32 %v456_v55, %v455_v53 }
 0x122   : > { %700 = vpush %v457_v56 }
 0x14f   : > { %s699_s1 = spop %698 }
 0x150   : > { %v446_v61 = vstv %s699_s1 }
 0x151   : > { %v447_v62 = vsel %vm1188_vm7, %v446_v61, 0.0 }
 0x152   : > { %448 = vst [vmem:[%s363_s29] sm:$0xff] %v447_v62 }
 0x153   : > { %s1211_s10 = spop %700 }
 0x154   : > { %v459_v63 = vstv %s1211_s10 }
 0x155   : > { %890 = shalt.err (!%p887_p5)
}
 0x156   : > { %s891_s7 = scalar_lea.hbm %s1202_s26, 128  ;;  %s895_s1 = scalar_lea.hbm %s1289_s4, 256 }
 0x157   : > { %p892_p6 = scmp.ne.s32.totalorder %s1202_s26, %s891_s7  ;;  %p896_p13 = scmp.lt.s32.totalorder %s1202_s26, %s1289_s4 }
 0x158   : > { %p897_p8 = scmp.lt.s32.totalorder %s895_s1, %s891_s7 }
 0x159   : > { %p893_p7 = pnand %p892_p6, %p1085_p9 }
 0x15a   : > { %p898_p12 = por %p897_p8, %p896_p13 }
 0x15b   : > { %p894_p10 = pneg %p893_p7 }
 0x15d   : > { %p899_p0 = pnand %p898_p12, %p894_p10 }
 0x15f   : > { %902 = shalt.err (!%p899_p0)
}
 0x160   : > { %708 = dma.vmem_to_hbm [thread:$0]  (%p1085_p9), %s1204_s15, 128, %s1202_s26, %s463_s24   ;;  %v460_v0 = vsel %vm1188_vm7, %v459_v63, 0.0 }
 0x161   : > { %461 = vst [vmem:[%s370_s2] sm:$0xff] %v460_v0  ;;  %s468_s21 = scalar_lea.sflag [#allocation10], %s1159_s9  ;;  %s903_s12 = scalar_lea.vmem %s1213_s16, 128 }
 0x162   : > { %p904_p1 = scmp.ne.s32.totalorder %s1213_s16, %s903_s12  ;;  %s999_s10 = smov [#allocation9]  }
 0x163   : > { %s907_s30 = sshll.u32 %s999_s10, 4  ;;  %s908_s30 = int_to_ptr.vmem [resolvable:$false] %s907_s30 }
 0x164   : > { %p905_p3 = pnand %p904_p1, %p1085_p9  ;;  %s909_s17 = scalar_lea.vmem %s908_s30, 256 }
 0x165   : > { %p910_p4 = scmp.lt.s32.totalorder %s1213_s16, %s908_s30  ;;  %p911_p5 = scmp.lt.s32.totalorder %s909_s17, %s903_s12 }
 0x166   : > { %p906_p2 = pneg %p905_p3 }
 0x167   : > { %p912_p6 = por %p911_p5, %p910_p4 }
 0x169   : > { %p913_p7 = pnand %p912_p6, %p906_p2 }
 0x16b   : > { %916 = shalt.err (!%p913_p7)
}
 0x16c   : > { %s917_s11 = scalar_lea.hbm %s1209_s28, 128  ;;  %s921_s2 = scalar_lea.hbm %s1290_s5, 256 }
 0x16d   : > { %p918_p10 = scmp.ne.s32.totalorder %s1209_s28, %s917_s11  ;;  %p922_p12 = scmp.lt.s32.totalorder %s1209_s28, %s1290_s5 }
 0x16e   : > { %p923_p0 = scmp.lt.s32.totalorder %s921_s2, %s917_s11 }
 0x16f   : > { %p919_p13 = pnand %p918_p10, %p1085_p9 }
 0x170   : > { %p924_p1 = por %p923_p0, %p922_p12 }
 0x171   : > { %p920_p8 = pneg %p919_p13 }
 0x173   : > { %p925_p3 = pnand %p924_p1, %p920_p8 }
 0x175   : > { %928 = shalt.err (!%p925_p3)
}
 0x176   : > { %709 = dma.vmem_to_hbm [thread:$0]  (%p1085_p9), %s1213_s16, 128, %s1209_s28, %s468_s21  }
 0x177 PF: > { %s508_s25 = sand.u32 1, %s971_s18   ;;  %p1310_p2 = scmp.ge.s32.totalorder %s991_s23, 2 }
 0x178   : > { %s509_s13 = scalar_lea.sflag [#allocation4], %s508_s25 }
 0x179   : > { %p723_p4 = pnand %p1310_p2, %p1092_p11 }
 0x17b   : > { %p724_p5 = pneg %p723_p4 }
 0x17d   : > { %962 = dma.done.wait (%p724_p5), %s509_s13, 128  }
 0x17e   : > { %964 = vsyncadd (%p724_p5), %s509_s13, 4294967168  ;;  %s518_s7 = scalar_lea.sflag [#allocation10], %s508_s25 }
 0x17f   : > { %966 = dma.done.wait (%p724_p5), %s518_s7, 128  }
 0x180   : > { %968 = vsyncadd (%p724_p5), %s518_s7, 4294967168  ;;  %s28_s23 = sadd.s32 1, %s991_s23   ;;  %s1311_s6 = sld [smem:[#allocation16_spill]] }
 0x181   : > { %p25_p6 = scmp.ge.s32.totalorder %s28_s23, 4   ;;  %s1312_s16 = sld [smem:[#allocation15_spill]] }
 0x182   : > { %s1313_s18 = smov %s975_s19  ;;  %s1314_s19 = smov %s979_s20 }
 0x183   : > { %s1316_s21 = smov %s987_s22  ;;  %27 = sbr.rel (!%p25_p6) target bundleno = 14 (0xe), region = 128 }
 0x186   : > { %s1315_s20 = smov %s1311_s6 }
 0x187   : > { %s1317_s22 = smov %s1312_s16 }
 0x188   :  { %523 = vsyncpa [#allocation3], 1 }
 0x189   :  { %525 = vsyncpa [#allocation3 + $0x1], 1 }
 0x18a   :  { %526 = vsyncpa [#allocation6], 1 }
 0x18b   :  { %528 = vsyncpa [#allocation6 + $0x1], 1 }
 0x18c   :  { %529 = vsyncpa [#allocation4], 1 }
 0x18d   :  { %531 = vsyncpa [#allocation4 + $0x1], 1 }
 0x18e   :  { %532 = vsyncpa [#allocation10], 1 }
 0x18f   :  { %534 = vsyncpa [#allocation10 + $0x1], 1 }

</bundles_post_ra>
